<compile_context>
chip_gen: v7x
topology: tpu7x:2x2x1
jax: 0.10.0
libtpu: 0.0.40
codegen_flags: <defaults>
</compile_context>

<pallas_src>
import jax
import jax.numpy as jnp
import numpy as np
from jax import lax
from jax.experimental import pallas as pl
from jax.experimental.pallas import tpu as pltpu


# ----------------------------------------------------------------------------
# Block sizing helpers (padded-byte accounting, v7x two-core cap).
# ----------------------------------------------------------------------------
def _padded_bytes_per_sample(H, W, dtype):
    """VMEM footprint of one (H, W) sample after (sublane, lane) padding."""
    itemsize = jnp.dtype(dtype).itemsize
    pack = max(1, 4 // itemsize)            # sub-32-bit dtypes pack along sublanes
    sublanes_per_vreg = 8 * pack
    vregs = pl.cdiv(H, sublanes_per_vreg) * pl.cdiv(W, 128)
    return vregs * 4096                     # one vreg tile = 4 KiB


def _pick_tb(B, H, W, dtype, target_padded_block_bytes):
    per = _padded_bytes_per_sample(H, W, dtype)
    tb = max(1, min(B, target_padded_block_bytes // per))
    # v7x: keep >= 4 blocks on the "parallel" batch axis so both TensorCores
    # get work (neutral on the single-core v5e/v6e).
    tb = min(tb, max(1, pl.cdiv(B, 4)))
    if tb < B:
        # (tb, 1) label blocks need the second-minor dim to be sublane-aligned.
        tb = min(B, max(8, (tb // 8) * 8))
    return tb


# ----------------------------------------------------------------------------
# Primary kernel: batched XLU permutes + mask select (no MXU, no casts).
# ----------------------------------------------------------------------------
def _rotate_kernel_xlu(lbl_ref, x_ref, o_ref):
    tb, n, _ = x_ref.shape
    x = x_ref[...]                               # (TB, N, N), native dtype
    k = lbl_ref[...].reshape(tb, 1, 1)           # (TB, 1, 1) int32 in {0,1,2,3}

    # All four rot90 variants, batched over TB, built only from lane-axis
    # reversals and minor-dim transposes (XLU slot; the VPU/MXU stay idle).
    y = lax.rev(x, (2,))                         # y[b,r,c]    = x[b, r, N-1-c]
    xt = jnp.transpose(x, (0, 2, 1))             # xt[b,r,c]   = x[b, c, r]
    rot1 = jnp.transpose(y, (0, 2, 1))           # rot1[b,r,c] = x[b, c, N-1-r]
    rot3 = lax.rev(xt, (2,))                     # rot3[b,r,c] = x[b, N-1-c, r]
    rot2 = jnp.transpose(lax.rev(rot1, (2,)), (0, 2, 1))  # x[b, N-1-r, N-1-c]

    # Per-sample select with broadcast masks; every output row is written
    # (labels outside {1,2,3} -- including garbage tail rows -- fall back to a
    # plain copy, whose out-of-range writes Pallas discards anyway).
    o_ref[...] = jnp.where(k == 1, rot1,
                 jnp.where(k == 2, rot2,
                 jnp.where(k == 3, rot3, x)))


def _rotate_xlu(x, label4, *, target_padded_block_bytes=1 << 20):
    B, H, W = x.shape
    tb = _pick_tb(B, H, W, x.dtype, target_padded_block_bytes)
    grid = (pl.cdiv(B, tb),)
    lbl = label4.reshape(B, 1)
    return pl.pallas_call(
        _rotate_kernel_xlu,
        out_shape=jax.ShapeDtypeStruct((B, H, W), x.dtype),
        grid_spec=pltpu.PrefetchScalarGridSpec(
            num_scalar_prefetch=0,
            grid=grid,
            in_specs=[pl.BlockSpec((tb, 1), lambda b: (b, 0)),
                      pl.BlockSpec((tb, H, W), lambda b: (b, 0, 0))],
            out_specs=pl.BlockSpec((tb, H, W), lambda b: (b, 0, 0)),
        ),
        compiler_params=pltpu.CompilerParams(
            dimension_semantics=("parallel",),
            vmem_limit_bytes=32 * 1024 * 1024),
    )(lbl, x)


# ----------------------------------------------------------------------------
# Fallback kernel: previously-validated per-sample J-permutation matmuls.
# Only used if the XLU probe fails to compile/run on this jax/libtpu combo.
# ----------------------------------------------------------------------------
def _rotate_kernel_mxu(label_ref, x_ref, o_ref):
    blk = pl.program_id(0)
    tb, n, _ = x_ref.shape
    total = label_ref.shape[0]

    row = lax.broadcasted_iota(jnp.int32, (n, n), 0)
    col = lax.broadcasted_iota(jnp.int32, (n, n), 1)
    J = (row + col == n - 1).astype(jnp.float32)   # exchange (anti-identity)

    @pl.loop(0, tb)
    def _(i):
        g = jnp.minimum(blk * tb + i, total - 1)   # clamp for a ragged tail
        k = label_ref[g]
        x = x_ref[i]

        @pl.when(k == 0)
        def _():
            o_ref[i] = x

        @pl.when(k == 1)                           # out = J @ x^T
        def _():
            r = lax.dot_general(J, x.astype(jnp.float32),
                                (((1,), (1,)), ((), ())),
                                preferred_element_type=jnp.float32)
            o_ref[i] = r.astype(o_ref.dtype)

        @pl.when(k == 2)                           # out = J @ x @ J
        def _():
            x32 = x.astype(jnp.float32)
            r = jnp.dot(jnp.dot(J, x32, preferred_element_type=jnp.float32),
                        J, preferred_element_type=jnp.float32)
            o_ref[i] = r.astype(o_ref.dtype)

        @pl.when(k == 3)                           # out = x^T @ J
        def _():
            r = lax.dot_general(x.astype(jnp.float32), J,
                                (((0,), (0,)), ((), ())),
                                preferred_element_type=jnp.float32)
            o_ref[i] = r.astype(o_ref.dtype)


def _rotate_mxu(x, label4, *, target_padded_block_bytes=1 << 20):
    B, H, W = x.shape
    tb = _pick_tb(B, H, W, x.dtype, target_padded_block_bytes)
    grid = (pl.cdiv(B, tb),)
    return pl.pallas_call(
        _rotate_kernel_mxu,
        out_shape=jax.ShapeDtypeStruct((B, H, W), x.dtype),
        grid_spec=pltpu.PrefetchScalarGridSpec(
            num_scalar_prefetch=1,
            grid=grid,
            in_specs=[pl.BlockSpec((tb, H, W), lambda b, lbl: (b, 0, 0))],
            out_specs=pl.BlockSpec((tb, H, W), lambda b, lbl: (b, 0, 0)),
        ),
        compiler_params=pltpu.CompilerParams(
            dimension_semantics=("parallel",),
            vmem_limit_bytes=32 * 1024 * 1024),
    )(label4, x)


# ----------------------------------------------------------------------------
# Feature probe: does the rev/transpose (XLU) kernel lower + run correctly?
# ----------------------------------------------------------------------------
_XLU_OK_CACHE = {}


def _xlu_kernel_ok(H, W, dtype):
    key = (H, W, jnp.dtype(dtype).name)
    if key not in _XLU_OK_CACHE:
        ok = False
        try:
            Bp = 8
            xp = (jnp.arange(Bp * H * W, dtype=jnp.float32)
                  .reshape(Bp, H, W).astype(dtype))
            lp = jnp.arange(Bp, dtype=jnp.int32) % 4
            got = jax.block_until_ready(_rotate_xlu(xp, lp))
            ref = jnp.stack([jnp.rot90(xp[i], int(lp[i])) for i in range(Bp)])
            ok = bool(jnp.array_equal(got, ref))
        except Exception:
            ok = False
        _XLU_OK_CACHE[key] = ok
    return _XLU_OK_CACHE[key]


# ----------------------------------------------------------------------------
# Public wrapper (matches RotateLayer.forward semantics).
# ----------------------------------------------------------------------------
def rotate_layer(x, label, *, target_padded_block_bytes=1 << 20):
    """x: (B, H, W) with H == W; label: (B,) int — # of CCW 90-degree rotations."""
    B, H, W = x.shape
    assert H == W, "RotateLayer kernel assumes square H == W feature maps"
    # Normalize to {0,1,2,3} (matches torch.rot90 for negative / >=4 labels).
    label4 = jnp.mod(label.astype(jnp.int32), 4)

    if _xlu_kernel_ok(H, W, x.dtype):
        return _rotate_xlu(x, label4,
                           target_padded_block_bytes=target_padded_block_bytes)
    return _rotate_mxu(x, label4,
                       target_padded_block_bytes=target_padded_block_bytes)


if __name__ == "__main__":
    key = jax.random.PRNGKey(0)
    B, H, W = 8, 16, 16
    x = jax.random.normal(key, (B, H, W), dtype=jnp.float32)
    # Includes k >= 4 and negative k to exercise the mod-4 normalization.
    label = jnp.array([0, 1, 2, 3, 4, 7, -1, 2], dtype=jnp.int32)

    out = rotate_layer(x, label)
    out = jax.block_until_ready(out)

    # Reference: numpy rot90 per batch element (same semantics as torch.rot90).
    x_np = np.asarray(x)
    lab_np = np.asarray(label)
    ref = np.stack([np.rot90(x_np[i], int(lab_np[i]), axes=(0, 1))
                    for i in range(B)])
    np.testing.assert_allclose(np.asarray(out), ref, rtol=1e-6, atol=1e-6)

    print("KERNEL_OK")
</pallas_src>

<mosaic_0001>
module attributes {stable_mosaic.version = 11 : i64} {
  func.func @_rotate_kernel_mxu(%arg0: i32, %arg1: memref<8xi32, #tpu.memory_space<smem>>, %arg2: memref<8x16x16xf32, #tpu.memory_space<vmem>>, %arg3: memref<8x16x16xf32, #tpu.memory_space<vmem>>) attributes {dimension_semantics = [#tpu.dimension_semantics<parallel>], iteration_bounds = array<i64: 1>, scalar_prefetch = 1 : i64, scratch_operands = 0 : i64, tpu.core_type = #tpu.core_type<tc>, window_params = [{transform_indices = @transform_0, window_bounds = array<i64: 8, 16, 16>}, {transform_indices = @transform_1, window_bounds = array<i64: 8, 16, 16>}]} {
    %0 = tpu.iota {dimensions = array<i32: 0>} : vector<16x16xi32>
    %1 = tpu.iota {dimensions = array<i32: 1>} : vector<16x16xi32>
    %2 = arith.addi %0, %1 : vector<16x16xi32>
    %c15_i32 = arith.constant 15 : i32
    %3 = vector.broadcast %c15_i32 : i32 to vector<16x16xi32>
    %4 = arith.cmpi eq, %2, %3 : vector<16x16xi32>
    %5 = arith.extui %4 : vector<16x16xi1> to vector<16x16xi32>
    %6 = arith.sitofp %5 : vector<16x16xi32> to vector<16x16xf32>
    %c0_i32 = arith.constant 0 : i32
    %c8_i32 = arith.constant 8 : i32
    %7 = arith.addi %c0_i32, %c8_i32 : i32
    %c1_i32 = arith.constant 1 : i32
    scf.for %arg4 = %c0_i32 to %7 step %c1_i32  : i32 {
      %c1_i32_1 = arith.constant 1 : i32
      %8 = arith.muli %arg4, %c1_i32_1 : i32
      %c0_i32_2 = arith.constant 0 : i32
      %9 = arith.addi %c0_i32_2, %8 : i32
      %c8_i32_3 = arith.constant 8 : i32
      %10 = arith.muli %arg0, %c8_i32_3 : i32
      %11 = arith.addi %10, %9 : i32
      %c7_i32 = arith.constant 7 : i32
      %12 = arith.minsi %11, %c7_i32 : i32
      %13 = arith.index_cast %12 : i32 to index
      %14 = memref.load %arg1[%13] : memref<8xi32, #tpu.memory_space<smem>>
      %15 = arith.index_cast %9 : i32 to index
      %c0 = arith.constant 0 : index
      %c0_4 = arith.constant 0 : index
      %16 = vector.load %arg2[%15, %c0, %c0_4] : memref<8x16x16xf32, #tpu.memory_space<vmem>>, vector<1x16x16xf32>
      %17 = vector.shape_cast %16 : vector<1x16x16xf32> to vector<16x16xf32>
      %c0_i32_5 = arith.constant 0 : i32
      %18 = arith.cmpi eq, %14, %c0_i32_5 : i32
      %19 = arith.extui %18 : i1 to i32
      %c0_i32_6 = arith.constant 0 : i32
      %20 = arith.cmpi ne, %19, %c0_i32_6 : i32
      scf.if %20 {
        %30 = arith.index_cast %9 : i32 to index
        %c0_11 = arith.constant 0 : index
        %c0_12 = arith.constant 0 : index
        %31 = vector.load %arg3[%30, %c0_11, %c0_12] : memref<8x16x16xf32, #tpu.memory_space<vmem>>, vector<1x16x16xf32>
        %32 = vector.shape_cast %31 : vector<1x16x16xf32> to vector<16x16xf32>
        %33 = vector.shape_cast %17 : vector<16x16xf32> to vector<1x16x16xf32>
        tpu.vector_store %arg3[%30, %c0_11, %c0_12], %33 {strides = array<i32>} : memref<8x16x16xf32, #tpu.memory_space<vmem>>, vector<1x16x16xf32>,
      } else {
      }
      %c1_i32_7 = arith.constant 1 : i32
      %21 = arith.cmpi eq, %14, %c1_i32_7 : i32
      %22 = arith.extui %21 : i1 to i32
      %c0_i32_8 = arith.constant 0 : i32
      %23 = arith.cmpi ne, %22, %c0_i32_8 : i32
      scf.if %23 {
        %cst = arith.constant dense<0.000000e+00> : vector<16x16xf32>
        %30 = tpu.matmul %6, %17, %cst {dimension_numbers = #tpu.dot_dimension_numbers<[1], [1], [0], [0], [0, 0, 1, 0], [], []>} : vector<16x16xf32>, vector<16x16xf32>, vector<16x16xf32> -> vector<16x16xf32>
        %31 = arith.index_cast %9 : i32 to index
        %c0_11 = arith.constant 0 : index
        %c0_12 = arith.constant 0 : index
        %32 = vector.load %arg3[%31, %c0_11, %c0_12] : memref<8x16x16xf32, #tpu.memory_space<vmem>>, vector<1x16x16xf32>
        %33 = vector.shape_cast %32 : vector<1x16x16xf32> to vector<16x16xf32>
        %34 = vector.shape_cast %30 : vector<16x16xf32> to vector<1x16x16xf32>
        tpu.vector_store %arg3[%31, %c0_11, %c0_12], %34 {strides = array<i32>} : memref<8x16x16xf32, #tpu.memory_space<vmem>>, vector<1x16x16xf32>,
      } else {
      }
      %c2_i32 = arith.constant 2 : i32
      %24 = arith.cmpi eq, %14, %c2_i32 : i32
      %25 = arith.extui %24 : i1 to i32
      %c0_i32_9 = arith.constant 0 : i32
      %26 = arith.cmpi ne, %25, %c0_i32_9 : i32
      scf.if %26 {
        %cst = arith.constant dense<0.000000e+00> : vector<16x16xf32>
        %30 = tpu.matmul %6, %17, %cst {dimension_numbers = #tpu.dot_dimension_numbers<[1], [0], [0], [1], [0, 0, 1, 1], [], []>} : vector<16x16xf32>, vector<16x16xf32>, vector<16x16xf32> -> vector<16x16xf32>
        %cst_11 = arith.constant dense<0.000000e+00> : vector<16x16xf32>
        %31 = tpu.matmul %30, %6, %cst_11 {dimension_numbers = #tpu.dot_dimension_numbers<[1], [0], [0], [1], [0, 0, 1, 1], [], []>} : vector<16x16xf32>, vector<16x16xf32>, vector<16x16xf32> -> vector<16x16xf32>
        %32 = arith.index_cast %9 : i32 to index
        %c0_12 = arith.constant 0 : index
        %c0_13 = arith.constant 0 : index
        %33 = vector.load %arg3[%32, %c0_12, %c0_13] : memref<8x16x16xf32, #tpu.memory_space<vmem>>, vector<1x16x16xf32>
        %34 = vector.shape_cast %33 : vector<1x16x16xf32> to vector<16x16xf32>
        %35 = vector.shape_cast %31 : vector<16x16xf32> to vector<1x16x16xf32>
        tpu.vector_store %arg3[%32, %c0_12, %c0_13], %35 {strides = array<i32>} : memref<8x16x16xf32, #tpu.memory_space<vmem>>, vector<1x16x16xf32>,
      } else {
      }
      %c3_i32 = arith.constant 3 : i32
      %27 = arith.cmpi eq, %14, %c3_i32 : i32
      %28 = arith.extui %27 : i1 to i32
      %c0_i32_10 = arith.constant 0 : i32
      %29 = arith.cmpi ne, %28, %c0_i32_10 : i32
      scf.if %29 {
        %cst = arith.constant dense<0.000000e+00> : vector<16x16xf32>
        %30 = tpu.matmul %17, %6, %cst {dimension_numbers = #tpu.dot_dimension_numbers<[0], [0], [1], [1], [0, 1, 1, 1], [], []>} : vector<16x16xf32>, vector<16x16xf32>, vector<16x16xf32> -> vector<16x16xf32>
        %31 = arith.index_cast %9 : i32 to index
        %c0_11 = arith.constant 0 : index
        %c0_12 = arith.constant 0 : index
        %32 = vector.load %arg3[%31, %c0_11, %c0_12] : memref<8x16x16xf32, #tpu.memory_space<vmem>>, vector<1x16x16xf32>
        %33 = vector.shape_cast %32 : vector<1x16x16xf32> to vector<16x16xf32>
        %34 = vector.shape_cast %30 : vector<16x16xf32> to vector<1x16x16xf32>
        tpu.vector_store %arg3[%31, %c0_11, %c0_12], %34 {strides = array<i32>} : memref<8x16x16xf32, #tpu.memory_space<vmem>>, vector<1x16x16xf32>,
      } else {
      }
    }
    %c8_i32_0 = arith.constant 8 : i32
    return
  }
  func.func @transform_0(%arg0: i32, %arg1: memref<8xi32, #tpu.memory_space<smem>>) -> (i32, i32, i32) {
    %c0_i32 = arith.constant 0 : i32
    %c0_i32_0 = arith.constant 0 : i32
    %c0_i32_1 = arith.constant 0 : i32
    return %arg0, %c0_i32, %c0_i32_0 : i32, i32, i32
  }
  func.func @transform_1(%arg0: i32, %arg1: memref<8xi32, #tpu.memory_space<smem>>) -> (i32, i32, i32) {
    %c0_i32 = arith.constant 0 : i32
    %c0_i32_0 = arith.constant 0 : i32
    %c0_i32_1 = arith.constant 0 : i32
    return %arg0, %c0_i32, %c0_i32_0 : i32, i32, i32
  }
}

</mosaic_0001>

<bundles_post_ra>
// kernel: tpu_custom_call.1
= control target key start
LH: loop header
LB: loop body
LE: loop exit
PB: predicated region body
PF: predicated region fallthrough
CT: control target
= control target key end

     0   :  { %s771_s0 = inlined_call_operand.hbm [shape: s32[8], index: 0, kind: input, shape index: {}]   ;;  %s772_s1 = inlined_call_operand.hbm [shape: f32[8,16,16], index: 1, kind: input, shape index: {}]   ;;  %s773_s2 = inlined_call_operand.hbm [shape: f32[8,16,16], index: 2, kind: output, shape index: {}]  }
   0x1   :  { %s582_s11 = scalar_lea.hbm %s771_s0, 16 }
   0x2   :  { %p583_p0 = scmp.ne.s32.totalorder %s771_s0, %s582_s11  ;;  %p586_p1 = scmp.lt.u32.totalorder %s582_s11, %s771_s0 }
   0x4   :  { %p588_p2 = pnand %p586_p1, %p583_p0 }
   0x6   :  { %591 = shalt.err (!%p588_p2)  }
   0x7   :  { %s650_s16 = smov [#allocation3]  }
   0x8   :  { %8 = dma.hbm_to_smem %s771_s0, 16, %s650_s16, [#allocation2] }
   0x9   :  { %640 = dma.done.wait [#allocation2], 16 }
   0xa   :  { %641 = vsyncadd [#allocation2], 4294967280 }
   0xb   :  { %10 = sfence }
   0xc   :  { %11 = vsyncpa [#allocation5], 0 }
   0xd   :  { %12 = vsyncpa [#allocation6], 0  ;;  %s651_s19 = smov [#allocation4]   ;;  %s592_s23 = scalar_lea.hbm %s772_s1, 2048 }
   0xe   :  { %s18_s20 = sshll.u32 %s651_s19, 4  ;;  %p593_p3 = scmp.ne.s32.totalorder %s772_s1, %s592_s23  ;;  %s19_s20 = int_to_ptr.vmem [resolvable:$true] %s18_s20 }
   0xf   :  { %p596_p4 = scmp.lt.u32.totalorder %s592_s23, %s772_s1 }
  0x11   :  { %p598_p5 = pnand %p596_p4, %p593_p3 }
  0x13   :  { %601 = shalt.err (!%p598_p5)
}
  0x14   :  { %s602_s0 = scalar_lea.vmem %s19_s20, 2048  ;;  %p607_p7 = scmp.lt.s32.totalorder %s19_s20, %s19_s20 }
  0x15   :  { %p603_p6 = scmp.ne.s32.totalorder %s19_s20, %s602_s0  ;;  %p608_p8 = scmp.lt.s32.totalorder %s602_s0, %s602_s0 }
  0x17   :  { %p609_p9 = por %p608_p8, %p607_p7 }
  0x19   :  { %p610_p10 = pnand %p609_p9, %p603_p6 }
  0x1b   :  { %613 = shalt.err (!%p610_p10)
}
  0x1c   :  { %s652_s28 = smov 128   ;;  %s653_s29 = smov 8  }
  0x1d   :  { %24 = dma.hbm_to_vmem [thread:$0]  %s772_s1, 2048, %s19_s20, [#allocation5], %s652_s28, %s652_s28, %s653_s29  }
  0x1e   :  { %642 = dma.done.wait [#allocation5], 2048  }
  0x1f   :  { %643 = vsyncadd [#allocation5], 4294965248  ;;  %v28_v0 = vlaneseq  ;;  %v654_v6 = vmov 0.0   ;;  %s714_s1 = smov 0  }
  0x21   :  { %v29_v1 = vshrl.u32 %v28_v0, 7  ;;  %v32_v2 = vand.u32 127, %v28_v0 }
  0x23   :  { %v30_v3 = vadd.s32 8, %v29_v1  ;;  %v700_v4 = vadd.s32 %v32_v2, %v29_v1 }
  0x25   :  { %v702_v5 = vadd.s32 %v32_v2, %v30_v3  ;;  %vm35_vm0 = vcmp.eq.s32.totalorder %v700_v4, 15 }
  0x26   :  { %v707_v7 = vsel %vm35_vm0, 1.0, %v654_v6 }
  0x27   :  { %vm36_vm1 = vcmp.eq.s32.totalorder %v702_v5, 15 }
  0x28   :  { %v712_v8 = vsel %vm36_vm1, 1.0, %v654_v6 }
  0x29 LB: > { %p49_p11 = scmp.lt.s32.totalorder %s648_s1, 7  ;;  %s721_s4 = sshll.u32 %s648_s1, 4  ;;  %s648_s1 = sphi %s714_s1, %s46_s1  }
  0x2a   : > { %s53_s6 = scalar_lea.vmem [#allocation4], %s721_s4 }
  0x2b   : > { %s50_s5 = scalar_select %p49_p11, %s648_s1, 7  ;;  %v54_v9 = vld [vmem:[%s53_s6] sm:$0xff]  ;;  %v55_v10 = vld [vmem:[%s53_s6 + $0x8] sm:$0xff] }
  0x2d   : > { %s725_s7 = sld [smem:[#allocation3 + %s50_s5]] }
  0x33   : > { %p485_p12 = scmp.ne.s32.totalorder %s725_s7, 0 }
  0x34   : > { %vm61_vm2 = vcmask (!%p485_p12), 130048   ;;  %s60_s8 = scalar_lea.vmem (!%p485_p12), [#allocation7], %s721_s4 }
  0x35   : > { %59 = sbr.rel (%p485_p12) target bundleno = 60 (0x3c), region = 20  ;;  %62 = vst.msk [vmem:[%s60_s8] sm:$0xff] (!%p485_p12), %vm61_vm2, %v54_v9  ;;  %63 = vst.msk [vmem:[%s60_s8 + $0x8] sm:$0xff] (!%p485_p12), %vm61_vm2, %v55_v10 }
  0x3c PF: > { %p486_p13 = scmp.ne.s32.totalorder %s725_s7, 1 }
  0x3d   : > { %vm68_vm3 = vcmask (!%p486_p13), 130048   ;;  %v547_v11 = vpack.c.bf16 (!%p486_p13), %v55_v10, %v54_v9  ;;  %s156_s9 = scalar_lea.vmem (!%p486_p13), [#allocation7], %s721_s4 }
  0x3e   : > { %67 = sbr.rel (%p486_p13) target bundleno = 285 (0x11d), region = 24  ;;  %vm548_vm4 = vmpackc.low (!%p486_p13), %vm68_vm3, %vm68_vm3  ;;  %523 = vmatprep.mubr.msk.f32.mxu0 (!%p486_p13), %vm68_vm3, %v707_v7 }
  0x3f   : > { %549 = vmatprep.subr.msk.bf16.mxu0 (!%p486_p13), %vm548_vm4, %v547_v11 }
  0x40   : > { %552 = vmatpush3.bf16.xpose.msk.msra.mxu0 (!%p486_p13), %vm548_vm4, %v547_v11 }
  0x47   : > { %524 = vmatmul.mubr.msk.f32.vlgmr.msra.gmra.mrb[0].mxu0 %vm68_vm3, %v712_v8 }
 0x11a   : > { %v525_v12 = vpop.f32.mrb[0].mxu0 }
 0x11b   : > { %158 = vst.msk [vmem:[%s156_s9 + $0x8] sm:$0xff] %vm68_vm3, %v525_v12  ;;  %v147_v13 = vpop.f32.mrb[1].mxu0 }
 0x11c   : > { %157 = vst.msk [vmem:[%s156_s9] sm:$0xff] %vm68_vm3, %v147_v13 }
 0x11d PF: > { %p491_p0 = scmp.ne.s32.totalorder %s725_s7, 2 }
 0x11e   : > { %v553_v14 = vpack.c.bf16 (!%p491_p0), %v55_v10, %v54_v9  ;;  %vm163_vm5 = vcmask (!%p491_p0), 130048   ;;  %vm557_vm6 = vmpackc.low (!%p491_p0), %vm36_vm1, %vm35_vm0  ;;  %v655_v15 = vmov (!%p491_p0), 1.0|1.0   ;;  %s326_s10 = scalar_lea.vmem (!%p491_p0), [#allocation7], %s721_s4 }
 0x11f   : > { %162 = sbr.rel (%p491_p0) target bundleno = 720 (0x2d0), region = 28  ;;  %530 = vmatprep.mubr.msk.f32.mxu0 (!%p491_p0), %vm163_vm5, %v707_v7  ;;  %558 = vmatprep.subr.msk.bf16.mxu1 (!%p491_p0), %vm557_vm6, %v655_v15 }
 0x120   : > { %554 = vmatprep.subr.bf16.mxu0 (!%p491_p0), %v553_v14  ;;  %560 = vmatpush3.bf16.msk.msra.mxu1 (!%p491_p0), %vm557_vm6, %v655_v15 }
 0x121   : > { %556 = vmatpush3.bf16.msra.mxu0 (!%p491_p0), %v553_v14 }
 0x124   : > { %531 = vmatmul.mubr.msk.f32.vlgmr.msra.gmra.mrb[0].mxu0 (!%p491_p0), %vm163_vm5, %v712_v8 }
 0x1f7   : > { %v532_v16 = vpop.f32.mrb[0].mxu0 }
 0x1f8   : > { %v236_v17 = vpop.f32.mrb[1].mxu0 }
 0x1f9   : > { %537 = vmatprep.mubr.msk.f32.mxu1 %vm163_vm5, %v236_v17 }
 0x1fa   : > { %538 = vmatmul.mubr.msk.f32.vlgmr.msra.gmra.mrb[0].mxu1 %vm163_vm5, %v532_v16 }
 0x2cd   : > { %v539_v18 = vpop.f32.mrb[0].mxu1 }
 0x2ce   : > { %328 = vst.msk [vmem:[%s326_s10 + $0x8] sm:$0xff] %vm163_vm5, %v539_v18  ;;  %v317_v19 = vpop.f32.mrb[1].mxu1 }
 0x2cf   : > { %327 = vst.msk [vmem:[%s326_s10] sm:$0xff] %vm163_vm5, %v317_v19 }
 0x2d0 PF: > { %p498_p1 = scmp.ne.s32.totalorder %s725_s7, 3 }
 0x2d1   : > { %333 = vxpose.xlu0.b32.start [1/2] (short) (narrow) (!%p498_p1), %v54_v9, 16  ;;  %vm561_vm7 = vmpackc.low (!%p498_p1), %vm36_vm1, %vm35_vm0  ;;  %v656_v20 = vmov (!%p498_p1), 1.0|1.0   ;;  %vm365_vm8 = vcmask (!%p498_p1), 130048   ;;  %s447_s11 = scalar_lea.vmem (!%p498_p1), [#allocation7], %s721_s4 }
 0x2d2   : > { %332 = sbr.rel (%p498_p1) target bundleno = 1068 (0x42c), region = 32  ;;  %562 = vmatprep.subr.msk.bf16.mxu0 (!%p498_p1), %vm561_vm7, %v656_v20 }
 0x2d3   : > { %564 = vmatpush3.bf16.msk.msra.mxu0 (!%p498_p1), %vm561_vm7, %v656_v20 }
 0x2d5   : > { %334 = vxpose.xlu0.b32.end [2/2] (short) (narrow) (!%p498_p1), %v55_v10, 16 }
 0x351   : > { %v349_v21 = vpop.trf.xlu0 }
 0x352   : > { %544 = vmatprep.mubr.msk.f32.mxu0 %vm365_vm8, %v349_v21 }
 0x355   : > { %v350_v22 = vpop.trf.xlu0 }
 0x356   : > { %545 = vmatmul.mubr.msk.f32.vlgmr.msra.gmra.mrb[0].mxu0 %vm365_vm8, %v350_v22 }
 0x429   : > { %v546_v23 = vpop.f32.mrb[0].mxu0 }
 0x42a   : > { %449 = vst.msk [vmem:[%s447_s11 + $0x8] sm:$0xff] %vm365_vm8, %v546_v23  ;;  %v438_v24 = vpop.f32.mrb[1].mxu0 }
 0x42b   : > { %448 = vst.msk [vmem:[%s447_s11] sm:$0xff] %vm365_vm8, %v438_v24 }
 0x42c PF: > { %s46_s1 = sadd.s32 1, %s648_s1  }
 0x42d   : > { %p43_p2 = scmp.ge.s32.totalorder %s46_s1, 8  }
 0x42e   :  { %s657_s12 = smov (%p43_p2), [#allocation7]  }
 0x42f   :  { %45 = sbr.rel (!%p43_p2) target bundleno = 41 (0x29), region = 56  ;;  %s455_s13 = sshll.u32 (%p43_p2), %s657_s12, 4  ;;  %s456_s13 = int_to_ptr.vmem [resolvable:$true] %s455_s13 }
 0x430   :  { %s614_s14 = scalar_lea.vmem (%p43_p2), %s456_s13, 2048  ;;  %p619_p4 = scmp.lt.s32.totalorder (%p43_p2), %s456_s13, %s456_s13 }
 0x431   :  { %p615_p3 = scmp.ne.s32.totalorder (%p43_p2), %s456_s13, %s614_s14  ;;  %p620_p5 = scmp.lt.s32.totalorder (%p43_p2), %s614_s14, %s614_s14 }
 0x433   :  { %p621_p6 = por (%p43_p2), %p620_p5, %p619_p4 }
 0x435   :  { %p622_p7 = pnand (%p43_p2), %p621_p6, %p615_p3 }
 0x437   :  { %625 = shalt.err (!%p622_p7)
}
 0x438   :  { %s626_s17 = scalar_lea.hbm %s773_s2, 2048 }
 0x439   :  { %p627_p8 = scmp.ne.s32.totalorder %s773_s2, %s626_s17  ;;  %p630_p9 = scmp.lt.u32.totalorder %s626_s17, %s773_s2 }
 0x43b   :  { %p632_p10 = pnand %p630_p9, %p627_p8 }
 0x43d   :  { %635 = shalt.err (!%p632_p10)
}
 0x43e   :  { %461 = dma.vmem_to_hbm [thread:$0]  %s456_s13, 2048, %s773_s2, [#allocation6], %s652_s28, %s652_s28, %s653_s29  }
 0x43f   :  { %644 = dma.done.wait [#allocation6], 2048  }
 0x440   :  { %645 = vsyncadd [#allocation6], 4294965248 }
 0x441   :  { %465 = vsyncpa [#allocation5], 1 }
 0x442   :  { %466 = vsyncpa [#allocation6], 1 }

</bundles_post_ra>
